<compile_context>
chip_gen: v7x
topology: tpu7x:2x2x1
jax: 0.10.0
libtpu: 0.0.40
codegen_flags: <defaults>
</compile_context>

<pallas_src>
import functools

import jax
import jax.numpy as jnp
from jax.experimental import pallas as pl
from jax.experimental.pallas import tpu as pltpu


_LANE = 128


def _elu(x):
    # ELU(alpha=1).  exp is evaluated on min(x, 0) so large positive (or
    # garbage edge-block) inputs never overflow; precision near 0 is within
    # ~1e-7 of expm1.
    return jnp.where(x > 0.0, x, jnp.exp(jnp.minimum(x, 0.0)) - 1.0)


def _decoder_kernel(z_ref, c_ref,
                    wz_ref, w4c_ref, b4_ref,
                    w5h_ref, b5_ref,
                    woh_ref, bo_ref,
                    o_ref, *, mxu_dtype, hp, op):
    zm = z_ref[...].astype(mxu_dtype)           # (bn, L)
    cm = c_ref[...].astype(mxu_dtype)           # (bn, C)

    # Fused z-projection: one (bn, L) x (L, 2*hp+op) matmul; per-layer pieces
    # are 128-aligned column slices (hp, op are multiples of 128) -> views.
    zp = jnp.dot(zm, wz_ref[...], preferred_element_type=jnp.float32)
    zp4 = zp[:, 0 * hp:1 * hp]
    zp5 = zp[:, 1 * hp:2 * hp]
    zpo = zp[:, 2 * hp:2 * hp + op]

    # h4 = elu(fc4(cat(z, c)))  ==  elu(z @ W4z + c @ W4c + b4)
    h4 = _elu(zp4
              + jnp.dot(cm, w4c_ref[...], preferred_element_type=jnp.float32)
              + b4_ref[...])

    # h5 = elu(fc5(cat(z, h4))) ==  elu(z @ W5z + h4 @ W5h + b5)
    h5 = _elu(zp5
              + jnp.dot(h4.astype(mxu_dtype), w5h_ref[...],
                        preferred_element_type=jnp.float32)
              + b5_ref[...])

    # out = out_linear(cat(z, h5)) ==  z @ Woz + h5 @ Woh + bo
    out = (zpo
           + jnp.dot(h5.astype(mxu_dtype), woh_ref[...],
                     preferred_element_type=jnp.float32)
           + bo_ref[...])

    o_ref[...] = out.astype(o_ref.dtype)


def _round_up(x, m):
    return ((x + m - 1) // m) * m


def _pad_to(a, rows, cols):
    return jnp.pad(a, ((0, rows - a.shape[0]), (0, cols - a.shape[1])))


@functools.partial(jax.jit, static_argnames=("block_n", "mxu_bf16"))
def decoder_forward(z, c,
                    w4z, w4c, b4,
                    w5z, w5h, b5,
                    woz, woh, bo,
                    *, block_n=1024, mxu_bf16=False):
    """Pallas equivalent of Decoder.forward(z, c).

    z:   (N, latent_size)
    c:   (N, frame_size * num_condition_frames)
    w*:  weights stored (in_features, out_features), pre-split at the
         z / non-z boundary; b*: (1, out_features).
    Returns (N, num_future_predictions * frame_size).
    """
    N, L = z.shape
    C = c.shape[1]
    H = w4z.shape[1]
    O = woz.shape[1]
    assert w4c.shape == (C, H) and w5z.shape == (L, H) and w5h.shape == (H, H)
    assert woh.shape == (H, O) and b4.shape == (1, H) and bo.shape == (1, O)

    # Lane-dense padded widths.
    Hp = _round_up(H, _LANE)
    Op = _round_up(O, _LANE)

    # Zero-padded weight slabs.  Padded h4/h5 columns come out as elu(0)=0 and
    # padded output columns as 0, so the math is unchanged.
    w4z_p = _pad_to(w4z, L, Hp)
    w5z_p = _pad_to(w5z, L, Hp)
    woz_p = _pad_to(woz, L, Op)
    wz_all = jnp.concatenate([w4z_p, w5z_p, woz_p], axis=1)  # (L, 2*Hp + Op)

    w4c_p = _pad_to(w4c, C, Hp)
    w5h_p = _pad_to(w5h, Hp, Hp)
    woh_p = _pad_to(woh, Hp, Op)
    b4_p = _pad_to(b4, 1, Hp)
    b5_p = _pad_to(b5, 1, Hp)
    bo_p = _pad_to(bo, 1, Op)

    mxu_dtype = jnp.bfloat16 if mxu_bf16 else jnp.float32
    if mxu_bf16:
        wz_all = wz_all.astype(jnp.bfloat16)
        w4c_p = w4c_p.astype(jnp.bfloat16)
        w5h_p = w5h_p.astype(jnp.bfloat16)
        woh_p = woh_p.astype(jnp.bfloat16)
    Wz = wz_all.shape[1]

    # Batch tile: big (amortizes ~0.35us/step overhead), clamped for small N.
    bn = min(block_n, _round_up(N, 8))
    # Make sure the "parallel" axis has >= 2 steps when the batch allows it,
    # so v7x's two TensorCores both get work (one extra tiny step elsewhere).
    if N > 8 and pl.cdiv(N, bn) < 2:
        bn = max(8, _round_up(pl.cdiv(N, 2), 8))
    grid = (pl.cdiv(N, bn),)   # partial edge block handled by Pallas masking

    kernel = functools.partial(_decoder_kernel, mxu_dtype=mxu_dtype,
                               hp=Hp, op=Op)
    const = lambda i: (0, 0)

    out = pl.pallas_call(
        kernel,
        out_shape=jax.ShapeDtypeStruct((N, Op), z.dtype),
        grid_spec=pltpu.PrefetchScalarGridSpec(
            num_scalar_prefetch=0,
            grid=grid,
            in_specs=[
                pl.BlockSpec((bn, L), lambda i: (i, 0)),   # z
                pl.BlockSpec((bn, C), lambda i: (i, 0)),   # c
                pl.BlockSpec((L, Wz), const),              # [W4z | W5z | Woz]
                pl.BlockSpec((C, Hp), const),              # W4c
                pl.BlockSpec((1, Hp), const),              # b4
                pl.BlockSpec((Hp, Hp), const),             # W5h
                pl.BlockSpec((1, Hp), const),              # b5
                pl.BlockSpec((Hp, Op), const),             # Woh
                pl.BlockSpec((1, Op), const),              # bo
            ],
            out_specs=pl.BlockSpec((bn, Op), lambda i: (i, 0)),
        ),
        compiler_params=pltpu.CompilerParams(
            dimension_semantics=("parallel",)),
    )(z, c, wz_all, w4c_p, b4_p, w5h_p, b5_p, woh_p, bo_p)

    return out[:, :O]


def _reference(z, c, w4z, w4c, b4, w5z, w5h, b5, woz, woh, bo):
    """Pure-JAX reference mirroring the PyTorch Decoder.forward."""
    w4 = jnp.concatenate([w4z, w4c], axis=0)     # cat(z, c) @ W4
    w5 = jnp.concatenate([w5z, w5h], axis=0)     # cat(z, h4) @ W5
    wo = jnp.concatenate([woz, woh], axis=0)     # cat(z, h5) @ Wo
    h4 = jax.nn.elu(jnp.concatenate([z, c], axis=1) @ w4 + b4)
    h5 = jax.nn.elu(jnp.concatenate([z, h4], axis=1) @ w5 + b5)
    return jnp.concatenate([z, h5], axis=1) @ wo + bo


if __name__ == "__main__":
    # Small shapes consistent with the module.
    frame_size = 16
    latent_size = 32
    hidden_size = 64
    num_condition_frames = 1
    num_future_predictions = 2

    cond_size = frame_size * num_condition_frames
    output_size = num_future_predictions * frame_size

    key = jax.random.PRNGKey(0)
    keys = jax.random.split(key, 13)

    def _init(k, shape, scale=0.1):
        return scale * jax.random.normal(k, shape, jnp.float32)

    # Linear weights stored as (in_features, out_features), pre-split at the
    # z / non-z boundary (pure layout plumbing; values match a single matrix).
    w4z = _init(keys[0], (latent_size, hidden_size))
    w4c = _init(keys[1], (cond_size, hidden_size))
    b4 = _init(keys[2], (1, hidden_size))
    w5z = _init(keys[3], (latent_size, hidden_size))
    w5h = _init(keys[4], (hidden_size, hidden_size))
    b5 = _init(keys[5], (1, hidden_size))
    woz = _init(keys[6], (latent_size, output_size))
    woh = _init(keys[7], (hidden_size, output_size))
    bo = _init(keys[8], (1, output_size))
    weights = (w4z, w4c, b4, w5z, w5h, b5, woz, woh, bo)

    # Case 1: sublane-aligned batch, single grid step (f32 parity path).
    z1 = jax.random.normal(keys[9], (8, latent_size), jnp.float32)
    c1 = jax.random.normal(keys[10], (8, cond_size), jnp.float32)
    out1 = jax.block_until_ready(decoder_forward(z1, c1, *weights))
    ref1 = _reference(z1, c1, *weights)
    assert out1.shape == (8, output_size)
    assert jnp.allclose(out1, ref1, atol=1e-5, rtol=1e-5), (
        float(jnp.max(jnp.abs(out1 - ref1))))

    # Case 2: batch not a multiple of the tile -> 2 grid steps + masked
    # partial edge block (no host-side padding of activations).
    z2 = jax.random.normal(keys[11], (20, latent_size), jnp.float32)
    c2 = jax.random.normal(keys[12], (20, cond_size), jnp.float32)
    out2 = jax.block_until_ready(decoder_forward(z2, c2, *weights))
    ref2 = _reference(z2, c2, *weights)
    assert out2.shape == (20, output_size)
    assert jnp.allclose(out2, ref2, atol=1e-5, rtol=1e-5), (
        float(jnp.max(jnp.abs(out2 - ref2))))

    # Case 3: bf16 MXU-operand fast path (v6e/v7x) -- looser tolerance.
    out3 = jax.block_until_ready(
        decoder_forward(z1, c1, *weights, mxu_bf16=True))
    assert out3.shape == (8, output_size)
    assert jnp.allclose(out3, ref1, atol=5e-2, rtol=5e-2), (
        float(jnp.max(jnp.abs(out3 - ref1))))

    print("KERNEL_OK")
</pallas_src>

<mosaic_0001>
module attributes {stable_mosaic.version = 11 : i64} {
  func.func @_decoder_kernel(%arg0: i32, %arg1: memref<8x32xf32, #tpu.memory_space<vmem>>, %arg2: memref<8x16xf32, #tpu.memory_space<vmem>>, %arg3: memref<32x384xf32, #tpu.memory_space<vmem>>, %arg4: memref<16x128xf32, #tpu.memory_space<vmem>>, %arg5: memref<1x128xf32, #tpu.memory_space<vmem>>, %arg6: memref<128x128xf32, #tpu.memory_space<vmem>>, %arg7: memref<1x128xf32, #tpu.memory_space<vmem>>, %arg8: memref<128x128xf32, #tpu.memory_space<vmem>>, %arg9: memref<1x128xf32, #tpu.memory_space<vmem>>, %arg10: memref<8x128xf32, #tpu.memory_space<vmem>>) attributes {dimension_semantics = [#tpu.dimension_semantics<parallel>], iteration_bounds = array<i64: 1>, scalar_prefetch = 0 : i64, scratch_operands = 0 : i64, tpu.core_type = #tpu.core_type<tc>, window_params = [{transform_indices = @transform_0, window_bounds = array<i64: 8, 32>}, {transform_indices = @transform_1, window_bounds = array<i64: 8, 16>}, {pipeline_mode = #tpu.pipeline_mode<synchronous>, transform_indices = @transform_2, window_bounds = array<i64: 32, 384>}, {pipeline_mode = #tpu.pipeline_mode<synchronous>, transform_indices = @transform_3, window_bounds = array<i64: 16, 128>}, {pipeline_mode = #tpu.pipeline_mode<synchronous>, transform_indices = @transform_4, window_bounds = array<i64: 1, 128>}, {pipeline_mode = #tpu.pipeline_mode<synchronous>, transform_indices = @transform_5, window_bounds = array<i64: 128, 128>}, {pipeline_mode = #tpu.pipeline_mode<synchronous>, transform_indices = @transform_6, window_bounds = array<i64: 1, 128>}, {pipeline_mode = #tpu.pipeline_mode<synchronous>, transform_indices = @transform_7, window_bounds = array<i64: 128, 128>}, {pipeline_mode = #tpu.pipeline_mode<synchronous>, transform_indices = @transform_8, window_bounds = array<i64: 1, 128>}, {transform_indices = @transform_9, window_bounds = array<i64: 8, 128>}]} {
    %c0 = arith.constant 0 : index
    %c0_0 = arith.constant 0 : index
    %0 = vector.load %arg1[%c0, %c0_0] : memref<8x32xf32, #tpu.memory_space<vmem>>, vector<8x32xf32>
    %c0_1 = arith.constant 0 : index
    %c0_2 = arith.constant 0 : index
    %1 = vector.load %arg2[%c0_1, %c0_2] : memref<8x16xf32, #tpu.memory_space<vmem>>, vector<8x16xf32>
    %c0_3 = arith.constant 0 : index
    %c0_4 = arith.constant 0 : index
    %2 = vector.load %arg3[%c0_3, %c0_4] : memref<32x384xf32, #tpu.memory_space<vmem>>, vector<32x384xf32>
    %cst = arith.constant dense<0.000000e+00> : vector<8x384xf32>
    %3 = tpu.matmul %0, %2, %cst {dimension_numbers = #tpu.dot_dimension_numbers<[1], [0], [0], [1], [0, 0, 1, 1], [], []>} : vector<8x32xf32>, vector<32x384xf32>, vector<8x384xf32> -> vector<8x384xf32>
    %4 = vector.extract_strided_slice %3 {offsets = [0, 0], sizes = [8, 128], strides = [1, 1]} : vector<8x384xf32> to vector<8x128xf32>
    %5 = vector.extract_strided_slice %3 {offsets = [0, 128], sizes = [8, 128], strides = [1, 1]} : vector<8x384xf32> to vector<8x128xf32>
    %6 = vector.extract_strided_slice %3 {offsets = [0, 256], sizes = [8, 128], strides = [1, 1]} : vector<8x384xf32> to vector<8x128xf32>
    %c0_5 = arith.constant 0 : index
    %c0_6 = arith.constant 0 : index
    %7 = vector.load %arg4[%c0_5, %c0_6] : memref<16x128xf32, #tpu.memory_space<vmem>>, vector<16x128xf32>
    %cst_7 = arith.constant dense<0.000000e+00> : vector<8x128xf32>
    %8 = tpu.matmul %1, %7, %cst_7 {dimension_numbers = #tpu.dot_dimension_numbers<[1], [0], [0], [1], [0, 0, 1, 1], [], []>} : vector<8x16xf32>, vector<16x128xf32>, vector<8x128xf32> -> vector<8x128xf32>
    %9 = arith.addf %4, %8 : vector<8x128xf32>
    %c0_8 = arith.constant 0 : index
    %c0_9 = arith.constant 0 : index
    %10 = vector.load %arg5[%c0_8, %c0_9] : memref<1x128xf32, #tpu.memory_space<vmem>>, vector<1x128xf32>
    %11 = vector.broadcast %10 : vector<1x128xf32> to vector<8x128xf32>
    %12 = arith.addf %9, %11 : vector<8x128xf32>
    %cst_10 = arith.constant 0.000000e+00 : f32
    %13 = vector.broadcast %cst_10 : f32 to vector<8x128xf32>
    %14 = arith.cmpf ogt, %12, %13 : vector<8x128xf32>
    %cst_11 = arith.constant 0.000000e+00 : f32
    %15 = vector.broadcast %cst_11 : f32 to vector<8x128xf32>
    %16 = arith.minimumf %12, %15 : vector<8x128xf32>
    %17 = math.exp %16 : vector<8x128xf32>
    %cst_12 = arith.constant 1.000000e+00 : f32
    %18 = vector.broadcast %cst_12 : f32 to vector<8x128xf32>
    %19 = arith.subf %17, %18 : vector<8x128xf32>
    %20 = arith.select %14, %12, %19 : vector<8x128xi1>, vector<8x128xf32>
    %c0_13 = arith.constant 0 : index
    %c0_14 = arith.constant 0 : index
    %21 = vector.load %arg6[%c0_13, %c0_14] : memref<128x128xf32, #tpu.memory_space<vmem>>, vector<128x128xf32>
    %cst_15 = arith.constant dense<0.000000e+00> : vector<8x128xf32>
    %22 = tpu.matmul %20, %21, %cst_15 {dimension_numbers = #tpu.dot_dimension_numbers<[1], [0], [0], [1], [0, 0, 1, 1], [], []>} : vector<8x128xf32>, vector<128x128xf32>, vector<8x128xf32> -> vector<8x128xf32>
    %23 = arith.addf %5, %22 : vector<8x128xf32>
    %c0_16 = arith.constant 0 : index
    %c0_17 = arith.constant 0 : index
    %24 = vector.load %arg7[%c0_16, %c0_17] : memref<1x128xf32, #tpu.memory_space<vmem>>, vector<1x128xf32>
    %25 = vector.broadcast %24 : vector<1x128xf32> to vector<8x128xf32>
    %26 = arith.addf %23, %25 : vector<8x128xf32>
    %cst_18 = arith.constant 0.000000e+00 : f32
    %27 = vector.broadcast %cst_18 : f32 to vector<8x128xf32>
    %28 = arith.cmpf ogt, %26, %27 : vector<8x128xf32>
    %cst_19 = arith.constant 0.000000e+00 : f32
    %29 = vector.broadcast %cst_19 : f32 to vector<8x128xf32>
    %30 = arith.minimumf %26, %29 : vector<8x128xf32>
    %31 = math.exp %30 : vector<8x128xf32>
    %cst_20 = arith.constant 1.000000e+00 : f32
    %32 = vector.broadcast %cst_20 : f32 to vector<8x128xf32>
    %33 = arith.subf %31, %32 : vector<8x128xf32>
    %34 = arith.select %28, %26, %33 : vector<8x128xi1>, vector<8x128xf32>
    %c0_21 = arith.constant 0 : index
    %c0_22 = arith.constant 0 : index
    %35 = vector.load %arg8[%c0_21, %c0_22] : memref<128x128xf32, #tpu.memory_space<vmem>>, vector<128x128xf32>
    %cst_23 = arith.constant dense<0.000000e+00> : vector<8x128xf32>
    %36 = tpu.matmul %34, %35, %cst_23 {dimension_numbers = #tpu.dot_dimension_numbers<[1], [0], [0], [1], [0, 0, 1, 1], [], []>} : vector<8x128xf32>, vector<128x128xf32>, vector<8x128xf32> -> vector<8x128xf32>
    %37 = arith.addf %6, %36 : vector<8x128xf32>
    %c0_24 = arith.constant 0 : index
    %c0_25 = arith.constant 0 : index
    %38 = vector.load %arg9[%c0_24, %c0_25] : memref<1x128xf32, #tpu.memory_space<vmem>>, vector<1x128xf32>
    %39 = vector.broadcast %38 : vector<1x128xf32> to vector<8x128xf32>
    %40 = arith.addf %37, %39 : vector<8x128xf32>
    %c0_26 = arith.constant 0 : index
    %c0_27 = arith.constant 0 : index
    %41 = vector.load %arg10[%c0_26, %c0_27] : memref<8x128xf32, #tpu.memory_space<vmem>>, vector<8x128xf32>
    tpu.vector_store %arg10[%c0_26, %c0_27], %40 {strides = array<i32>} : memref<8x128xf32, #tpu.memory_space<vmem>>, vector<8x128xf32>,
    return
  }
  func.func @transform_0(%arg0: i32) -> (i32, i32) {
    %c0_i32 = arith.constant 0 : i32
    %c0_i32_0 = arith.constant 0 : i32
    return %arg0, %c0_i32 : i32, i32
  }
  func.func @transform_1(%arg0: i32) -> (i32, i32) {
    %c0_i32 = arith.constant 0 : i32
    %c0_i32_0 = arith.constant 0 : i32
    return %arg0, %c0_i32 : i32, i32
  }
  func.func @transform_2(%arg0: i32) -> (i32, i32) {
    %c0_i32 = arith.constant 0 : i32
    %c0_i32_0 = arith.constant 0 : i32
    %c0_i32_1 = arith.constant 0 : i32
    return %c0_i32, %c0_i32_0 : i32, i32
  }
  func.func @transform_3(%arg0: i32) -> (i32, i32) {
    %c0_i32 = arith.constant 0 : i32
    %c0_i32_0 = arith.constant 0 : i32
    %c0_i32_1 = arith.constant 0 : i32
    return %c0_i32, %c0_i32_0 : i32, i32
  }
  func.func @transform_4(%arg0: i32) -> (i32, i32) {
    %c0_i32 = arith.constant 0 : i32
    %c0_i32_0 = arith.constant 0 : i32
    %c0_i32_1 = arith.constant 0 : i32
    return %c0_i32, %c0_i32_0 : i32, i32
  }
  func.func @transform_5(%arg0: i32) -> (i32, i32) {
    %c0_i32 = arith.constant 0 : i32
    %c0_i32_0 = arith.constant 0 : i32
    %c0_i32_1 = arith.constant 0 : i32
    return %c0_i32, %c0_i32_0 : i32, i32
  }
  func.func @transform_6(%arg0: i32) -> (i32, i32) {
    %c0_i32 = arith.constant 0 : i32
    %c0_i32_0 = arith.constant 0 : i32
    %c0_i32_1 = arith.constant 0 : i32
    return %c0_i32, %c0_i32_0 : i32, i32
  }
  func.func @transform_7(%arg0: i32) -> (i32, i32) {
    %c0_i32 = arith.constant 0 : i32
    %c0_i32_0 = arith.constant 0 : i32
    %c0_i32_1 = arith.constant 0 : i32
    return %c0_i32, %c0_i32_0 : i32, i32
  }
  func.func @transform_8(%arg0: i32) -> (i32, i32) {
    %c0_i32 = arith.constant 0 : i32
    %c0_i32_0 = arith.constant 0 : i32
    %c0_i32_1 = arith.constant 0 : i32
    return %c0_i32, %c0_i32_0 : i32, i32
  }
  func.func @transform_9(%arg0: i32) -> (i32, i32) {
    %c0_i32 = arith.constant 0 : i32
    %c0_i32_0 = arith.constant 0 : i32
    return %arg0, %c0_i32 : i32, i32
  }
}

</mosaic_0001>

<bundles_post_ra>
// kernel: decoder_forward.1
= control target key start
LH: loop header
LB: loop body
LE: loop exit
PB: predicated region body
PF: predicated region fallthrough
CT: control target
= control target key end

     0   :  { %v729_v7 = vmov 0.0   ;;  %v730_v8 = vmov 0.0|0.0   ;;  %vm731_vm0 = vmmov 0   ;;  %s971_s0 = inlined_call_operand.vmem [shape: f32[8,32], index: 0, kind: input, shape index: {}]   ;;  %s972_s1 = inlined_call_operand.vmem [shape: f32[8,16], index: 1, kind: input, shape index: {}]   ;;  %s973_s2 = inlined_call_operand.vmem [shape: f32[32,384], index: 2, kind: input, shape index: {}]   ;;  %s974_s3 = inlined_call_operand.vmem [shape: f32[16,128], index: 3, kind: input, shape index: {}]   ;;  %s975_s4 = inlined_call_operand.vmem [shape: f32[1,128], index: 4, kind: input, shape index: {}]   ;;  %s976_s5 = inlined_call_operand.vmem [shape: f32[128,128], index: 5, kind: input, shape index: {}]   ;;  %s977_s6 = inlined_call_operand.vmem [shape: f32[1,128], index: 6, kind: input, shape index: {}]   ;;  %s978_s7 = inlined_call_operand.vmem [shape: f32[128,128], index: 7, kind: input, shape index: {}]   ;;  %s979_s8 = inlined_call_operand.vmem [shape: f32[1,128], index: 8, kind: input, shape index: {}]   ;;  %s980_s9 = inlined_call_operand.hbm [shape: f32[8,128], index: 9, kind: output, shape index: {}]  }
   0x1   :  { %v36_v0 = vld [vmem:[%s973_s2 + $0x8] sm:$0xff]  ;;  %v39_v1 = vld [vmem:[%s973_s2 + $0x20] sm:$0xff]  ;;  %v38_v4 = vld [vmem:[%s973_s2 + $0x18] sm:$0xff]  ;;  %115 = vmatprep.mubr.f32.mxu0 %v729_v7  ;;  %640 = vmatprep.subr.bf16.mxu1 %v730_v8 }
   0x2   :  { %v35_v2 = vld [vmem:[%s973_s2] sm:$0xff]  ;;  %v632_v3 = vpack.c.bf16 %v39_v1, %v36_v0  ;;  %v42_v5 = vld [vmem:[%s973_s2 + $0x38] sm:$0xff]  ;;  %v45_v6 = vld [vmem:[%s973_s2 + $0x50] sm:$0xff]  ;;  %552 = vmatprep.mubr.msk.f32.mxu1 %vm731_vm0, %v729_v7 }
   0x3   :  { %v634_v9 = vpack.c.bf16 %v38_v4, %v35_v2  ;;  %v636_v10 = vpack.c.bf16 %v45_v6, %v42_v5  ;;  %v41_v11 = vld [vmem:[%s973_s2 + $0x30] sm:$0xff]  ;;  %v44_v12 = vld [vmem:[%s973_s2 + $0x48] sm:$0xff]  ;;  %v43_v16 = vld [vmem:[%s973_s2 + $0x40] sm:$0xff] }
   0x4   :  { %633 = vmatprep.subr.bf16.mxu0 %v632_v3  ;;  %v638_v13 = vpack.c.bf16 %v44_v12, %v41_v11  ;;  %v37_v14 = vld [vmem:[%s973_s2 + $0x10] sm:$0xff]  ;;  %v40_v15 = vld [vmem:[%s973_s2 + $0x28] sm:$0xff]  ;;  %v192_v17 = vld [vmem:[%s974_s3] sm:$0xff] }
   0x5   :  { %635 = vmatpush1.bf16.msra.mxu0 %v634_v9  ;;  %v193_v18 = vld [vmem:[%s974_s3 + $0x8] sm:$0xff]  ;;  %v641_v19 = vpack.c.bf16 %v40_v15, %v37_v14  ;;  %v46_v20 = vld [vmem:[%s973_s2 + $0x58] sm:$0xff] }
   0x6   :  { %637 = vmatprep.subr.bf16.mxu0 %v636_v10 }
   0x7   :  { %14 = vsyncpa [#allocation3], 0  ;;  %642 = vmatpush3.bf16.msra.mxu1 %v641_v19  ;;  %v644_v21 = vpack.c.bf16 %v46_v20, %v43_v16  ;;  %v33_v22 = vld [vmem:[%s971_s0] sm:$0xff]  ;;  %vm47_vm1 = vcmask 261120   ;;  %v647_v23 = vpack.c.bf16 %v193_v18, %v192_v17  ;;  %v284_v25 = vld [vmem:[%s976_s5 + $0x8] sm:$0xff]  ;;  %vm194_vm2 = vcmask 130048  }
   0x8   :  { %643 = vmatprep.subr.bf16.mxu1 %v730_v8  ;;  %v283_v24 = vld [vmem:[%s976_s5] sm:$0xff]  ;;  %v285_v28 = vld [vmem:[%s976_s5 + $0x10] sm:$0xff]  ;;  %v286_v29 = vld [vmem:[%s976_s5 + $0x18] sm:$0xff]  ;;  %s732_s11 = smov [#allocation2]  }
   0x9   :  { %639 = vmatpush1.bf16.msra.mxu0 %v638_v13  ;;  %v650_v26 = vpack.c.bf16 %v284_v25, %v283_v24  ;;  %v34_v27 = vld [vmem:[%s972_s1] sm:$0xff]  ;;  %v653_v30 = vpack.c.bf16 %v286_v29, %v285_v28  ;;  %v288_v32 = vld [vmem:[%s976_s5 + $0x28] sm:$0xff]  ;;  %v289_v34 = vld [vmem:[%s976_s5 + $0x30] sm:$0xff]  ;;  %s486_s12 = sshll.u32 %s732_s11, 4  ;;  %s487_s12 = int_to_ptr.vmem [resolvable:$true] %s486_s12 }
   0xa   :  { %646 = vmatprep.subr.bf16.mxu0 %v730_v8  ;;  %v287_v31 = vld [vmem:[%s976_s5 + $0x20] sm:$0xff]  ;;  %v290_v35 = vld [vmem:[%s976_s5 + $0x38] sm:$0xff]  ;;  %v292_v38 = vld [vmem:[%s976_s5 + $0x48] sm:$0xff]  ;;  %p710_p1 = scmp.lt.s32.totalorder %s487_s12, %s487_s12 }
   0xb   :  { %645 = vmatpush3.bf16.msra.mxu1 %v644_v21  ;;  %v656_v33 = vpack.c.bf16 %v288_v32, %v287_v31  ;;  %v659_v36 = vpack.c.bf16 %v290_v35, %v289_v34  ;;  %v291_v37 = vld [vmem:[%s976_s5 + $0x40] sm:$0xff]  ;;  %v293_v40 = vld [vmem:[%s976_s5 + $0x50] sm:$0xff]  ;;  %v294_v41 = vld [vmem:[%s976_s5 + $0x58] sm:$0xff] }
   0xc   :  { %494 = vmatmul.mubr.msk.f32.vlgmr.msra.gmra.mrb[0].mxu0 %vm47_vm1, %v33_v22  ;;  %649 = vmatprep.subr.bf16.mxu1 %v730_v8  ;;  %v662_v39 = vpack.c.bf16 %v292_v38, %v291_v37  ;;  %v295_v42 = vld [vmem:[%s976_s5 + $0x60] sm:$0xff]  ;;  %v665_v43 = vpack.c.bf16 %v294_v41, %v293_v40  ;;  %v296_v44 = vld [vmem:[%s976_s5 + $0x68] sm:$0xff]  ;;  %v297_v46 = vld [vmem:[%s976_s5 + $0x70] sm:$0xff] }
   0xd   :  { %648 = vmatpush3.bf16.msra.mxu0 %v647_v23  ;;  %559 = vmatprep.mubr.msk.f32.mxu0 %vm731_vm0, %v729_v7  ;;  %v668_v45 = vpack.c.bf16 %v296_v44, %v295_v42  ;;  %v298_v47 = vld [vmem:[%s976_s5 + $0x78] sm:$0xff]  ;;  %v384_v49 = vld [vmem:[%s978_s7] sm:$0xff]  ;;  %v385_v50 = vld [vmem:[%s978_s7 + $0x8] sm:$0xff] }
   0xe   :  { %673 = vmatprep.subr.bf16.mxu0 %v730_v8  ;;  %553 = vmatmul.mubr.msk.f32.vlgmr.msra.gmra.mrb[0].mxu1 %vm47_vm1, %v33_v22  ;;  %v671_v48 = vpack.c.bf16 %v298_v47, %v297_v46  ;;  %v386_v51 = vld [vmem:[%s978_s7 + $0x10] sm:$0xff]  ;;  %v674_v52 = vpack.c.bf16 %v385_v50, %v384_v49  ;;  %v387_v53 = vld [vmem:[%s978_s7 + $0x18] sm:$0xff]  ;;  %v497_v59 = vld [vmem:[%s975_s4] ss:$0 sm:$0xff] }
   0xf   :  { %651 = vmatpush3.bf16.msra.mxu1 %v650_v26  ;;  %594 = vmatprep.mubr.msk.f32.mxu1 %vm731_vm0, %v729_v7  ;;  %v677_v54 = vpack.c.bf16 %v387_v53, %v386_v51  ;;  %v388_v5 = vld [vmem:[%s978_s7 + $0x20] sm:$0xff]  ;;  %v389_v6 = vld [vmem:[%s978_s7 + $0x28] sm:$0xff]  ;;  %v390_v9 = vld [vmem:[%s978_s7 + $0x30] sm:$0xff] }
  0x10   :  { %560 = vmatmul.mubr.msk.f32.vlgmr.msra.gmra.mrb[2].mxu0 %vm194_vm2, %v34_v27  ;;  %652 = vmatprep.subr.bf16.mxu1 %v730_v8  ;;  %v391_v10 = vld [vmem:[%s978_s7 + $0x38] sm:$0xff]  ;;  %v392_v12 = vld [vmem:[%s978_s7 + $0x40] sm:$0xff]  ;;  %v393_v13 = vld [vmem:[%s978_s7 + $0x48] sm:$0xff] }
  0x11   :  { %629 = vmatprep.mubr.msk.f32.mxu0 %vm731_vm0, %v729_v7  ;;  %675 = vmatpush3.bf16.msra.mxu0 %v674_v52  ;;  %v680_v7 = vpack.c.bf16 %v389_v6, %v388_v5  ;;  %v683_v11 = vpack.c.bf16 %v391_v10, %v390_v9  ;;  %v686_v14 = vpack.c.bf16 %v393_v13, %v392_v12  ;;  %v394_v15 = vld [vmem:[%s978_s7 + $0x50] sm:$0xff]  ;;  %v395_v16 = vld [vmem:[%s978_s7 + $0x58] sm:$0xff]  ;;  %v396_v17 = vld [vmem:[%s978_s7 + $0x60] sm:$0xff] }
  0x12   :  { %676 = vmatprep.subr.bf16.mxu0 %v730_v8  ;;  %v689_v18 = vpack.c.bf16 %v395_v16, %v394_v15  ;;  %v397_v19 = vld [vmem:[%s978_s7 + $0x68] sm:$0xff]  ;;  %v398_v21 = vld [vmem:[%s978_s7 + $0x70] sm:$0xff]  ;;  %v399_v22 = vld [vmem:[%s978_s7 + $0x78] sm:$0xff] }
  0x13   :  { %654 = vmatpush3.bf16.msra.mxu1 %v653_v30  ;;  %v692_v20 = vpack.c.bf16 %v397_v19, %v396_v17  ;;  %v695_v23 = vpack.c.bf16 %v399_v22, %v398_v21  ;;  %v499_v25 = vld [vmem:[%s977_s6] ss:$0 sm:$0xff]  ;;  %s705_s6 = scalar_lea.vmem %s487_s12, 128 }
  0x14   :  { %655 = vmatprep.subr.bf16.mxu1 %v730_v8  ;;  %p706_p0 = scmp.ne.s32.totalorder %s487_s12, %s705_s6  ;;  %p711_p2 = scmp.lt.s32.totalorder %s705_s6, %s705_s6 }
  0x15   :  { %678 = vmatpush3.bf16.msra.mxu0 %v677_v54 }
  0x16   :  { %679 = vmatprep.subr.bf16.mxu0 %v730_v8  ;;  %p712_p3 = por %p711_p2, %p710_p1 }
  0x17   :  { %657 = vmatpush3.bf16.msra.mxu1 %v656_v33 }
  0x18   :  { %658 = vmatprep.subr.bf16.mxu1 %v730_v8  ;;  %p713_p4 = pnand %p712_p3, %p706_p0 }
  0x19   :  { %681 = vmatpush3.bf16.msra.mxu0 %v680_v7 }
  0x1a   :  { %682 = vmatprep.subr.bf16.mxu0 %v730_v8 }
  0x1b   :  { %660 = vmatpush3.bf16.msra.mxu1 %v659_v36 }
  0x1c   :  { %661 = vmatprep.subr.bf16.mxu1 %v730_v8 }
  0x1d   :  { %684 = vmatpush3.bf16.msra.mxu0 %v683_v11 }
  0x1e   :  { %685 = vmatprep.subr.bf16.mxu0 %v730_v8 }
  0x1f   :  { %663 = vmatpush3.bf16.msra.mxu1 %v662_v39 }
  0x20   :  { %664 = vmatprep.subr.bf16.mxu1 %v730_v8 }
  0x21   :  { %687 = vmatpush3.bf16.msra.mxu0 %v686_v14 }
  0x22   :  { %688 = vmatprep.subr.bf16.mxu0 %v730_v8 }
  0x23   :  { %666 = vmatpush3.bf16.msra.mxu1 %v665_v43 }
  0x24   :  { %667 = vmatprep.subr.bf16.mxu1 %v730_v8 }
  0x25   :  { %690 = vmatpush3.bf16.msra.mxu0 %v689_v18 }
  0x26   :  { %691 = vmatprep.subr.bf16.mxu0 %v730_v8 }
  0x27   :  { %669 = vmatpush3.bf16.msra.mxu1 %v668_v45 }
  0x28   :  { %670 = vmatprep.subr.bf16.mxu1 %v730_v8 }
  0x29   :  { %693 = vmatpush3.bf16.msra.mxu0 %v692_v20 }
  0x2a   :  { %694 = vmatprep.subr.bf16.mxu0 %v730_v8  ;;  %v501_v8 = vld [vmem:[%s979_s8] ss:$0 sm:$0xff] }
  0x2b   :  { %672 = vmatpush3.bf16.msra.mxu1 %v671_v48 }
  0x2d   :  { %696 = vmatpush3.bf16.msra.mxu0 %v695_v23 }
  0xdf   :  { %v117_v55 = vpop.f32.mrb[0].mxu0 }
  0xe0   :  { %v119_v56 = vpop.f32.mrb[1].mxu0 }
  0xe1   :  { %v188_v57 = vpop.f32.mrb[0].mxu1 }
  0xe2   :  { %v554_v60 = vpop.f32.mrb[1].mxu1 }
  0xe3   :  { %v264_v58 = vpop.f32.mrb[2].mxu0 }
  0xe4   :  { %v268_v61 = vadd.f32 %v264_v58, %v117_v55  ;;  %v561_v62 = vpop.f32.mrb[3].mxu0 }
  0xe6   :  { %v276_v63 = vadd.f32 %v497_v59, %v268_v61 }
  0xe8   :  { %v278_v0 = vmin.f32 %v276_v63, 0.0  ;;  %vm277_vm3 = vcmp.gt.f32.partialorder %v276_v63, 0.0 }
  0xea   :  { %v279_v1 = vmul.f32 1.442695, %v278_v0 }
  0xec   :  { %701 = vpow2.f32 %v279_v1 }
  0xf6   :  { %v702_v2 = vpop.eup %701 }
  0xf7   :  { %v498_v3 = vadd.f32 -1.0, %v702_v2 }
  0xf9   :  { %v282_v4 = vsel %vm277_vm3, %v276_v63, %v498_v3 }
  0xfa   :  { %595 = vmatmul.mubr.f32.vlgmr.msra.gmra.mrb[2].mxu1 %v282_v4 }
 0x1cd   :  { %v365_v24 = vpop.f32.mrb[2].mxu1 }
 0x1ce   :  { %v369_v26 = vadd.f32 %v365_v24, %v119_v56  ;;  %v596_v27 = vpop.f32.mrb[3].mxu1 }
 0x1d0   :  { %v377_v28 = vadd.f32 %v499_v25, %v369_v26 }
 0x1d2   :  { %v379_v29 = vmin.f32 %v377_v28, 0.0  ;;  %vm378_vm4 = vcmp.gt.f32.partialorder %v377_v28, 0.0 }
 0x1d4   :  { %v380_v30 = vmul.f32 1.442695, %v379_v29 }
 0x1d6   :  { %703 = vpow2.f32 %v380_v30 }
 0x1e0   :  { %v704_v31 = vpop.eup %703 }
 0x1e1   :  { %v500_v32 = vadd.f32 -1.0, %v704_v31 }
 0x1e3   :  { %v383_v33 = vsel %vm378_vm4, %v377_v28, %v500_v32 }
 0x1e4   :  { %630 = vmatmul.mubr.f32.vlgmr.msra.gmra.mrb[4].mxu0 %v383_v33 }
 0x2b7   :  { %v466_v34 = vpop.f32.mrb[4].mxu0 }
 0x2b8   :  { %v470_v35 = vadd.f32 %v466_v34, %v188_v57  ;;  %v631_v36 = vpop.f32.mrb[5].mxu0 }
 0x2ba   :  { %v478_v37 = vadd.f32 %v501_v8, %v470_v35 }
 0x2bc   :  { %479 = vst [vmem:[#allocation2] sm:$0xff] %v478_v37 }
 0x2bd   :  { %716 = shalt.err (!%p713_p4)
}
 0x2be   :  { %s717_s4 = scalar_lea.hbm %s980_s9, 128 }
 0x2bf   :  { %p718_p5 = scmp.ne.s32.totalorder %s980_s9, %s717_s4  ;;  %p721_p6 = scmp.lt.u32.totalorder %s717_s4, %s980_s9 }
 0x2c1   :  { %p723_p7 = pnand %p721_p6, %p718_p5 }
 0x2c3   :  { %726 = shalt.err (!%p723_p7)
}
 0x2c4   :  { %489 = dma.vmem_to_hbm [thread:$0]  %s487_s12, 128, %s980_s9, [#allocation3]  }
 0x2c5   :  { %727 = dma.done.wait [#allocation3], 128  }
 0x2c6   :  { %728 = vsyncadd [#allocation3], 4294967168 }
 0x2c7   :  { %493 = vsyncpa [#allocation3], 1 }

</bundles_post_ra>
